<compile_context>
chip_gen: v6e
topology: v6e:2x2x1
jax: 0.10.0
libtpu: 0.0.40
codegen_flags: <defaults>
</compile_context>

<pallas_src>
import jax
import jax.numpy as jnp
from jax.experimental import pallas as pl
from jax.experimental.pallas import tpu as pltpu

# Original rows folded into one lane-dense slab row: G * embed_dim = 8*48 = 384
# = 3*128 -> output stores are fully lane-dense (unmasked vst).
_G = 8
# Original rows per grid step (multiple of G*8 = 64 keeps the slab tile
# (8,128)-aligned).  16K rows -> ~3.5 MB/block, ~7 MB double-buffered VMEM.
_DEFAULT_TILE_ROWS = 16384


def _patch_embed_kernel(x_ref, w_ref, b_ref, o_ref):
    # x_ref: (T, G*C_in) slab; w_ref: (G*C_in, G*E) block-diagonal W^T
    # (VMEM-resident); b_ref: (1, G*E) tiled bias; o_ref: (T, G*E) lane-dense.
    acc = jnp.dot(x_ref[...], w_ref[...], preferred_element_type=jnp.float32)
    o_ref[...] = (acc + b_ref[...]).astype(o_ref.dtype)


def _round_up(x, m):
    return ((x + m - 1) // m) * m


def patch_embed(x, weight, bias, *, tile_rows=_DEFAULT_TILE_ROWS):
    """PatchEmbed forward: x @ weight.T + bias on the trailing dim.

    x: (..., C_in) float32; weight: (E, C_in); bias: (E,). Returns (..., E).
    """
    orig_shape = x.shape
    c_in = orig_shape[-1]
    e = weight.shape[0]

    m = 1
    for d in orig_shape[:-1]:
        m *= d

    # Pad rows only to slab granularity (G rows * 8 sublanes = 64); when m is
    # already aligned the pad is a no-op and the slab view is metadata-only.
    m_pad = _round_up(m, _G * 8)
    x2d = x.reshape(m, c_in)
    if m_pad != m:
        x2d = jnp.pad(x2d, ((0, m_pad - m), (0, 0)))
    x_slab = x2d.reshape(m_pad // _G, _G * c_in)          # row-major metadata view

    # Block-diagonal weight: G copies of W^T on the diagonal so one slab-row
    # matmul computes G independent (x @ W^T) rows contiguously.
    w_big = jnp.kron(jnp.eye(_G, dtype=weight.dtype), weight.T)  # (G*C_in, G*E)
    b_slab = jnp.tile(bias, _G)[None, :]                          # (1, G*E)

    # Tile size: multiple of 64 original rows, clamped for small inputs.
    tile_rows = max(_G * 8, min(tile_rows, m_pad))
    tile_rows = _round_up(tile_rows, _G * 8)

    slab_rows = m_pad // _G
    tile_slab = tile_rows // _G
    grid = (pl.cdiv(slab_rows, tile_slab),)   # partial final block is masked

    cost = pl.CostEstimate(
        flops=2 * m * c_in * e,
        transcendentals=0,
        bytes_accessed=(m * c_in + m * e + weight.size + bias.size) * 4,
    )

    out_slab = pl.pallas_call(
        _patch_embed_kernel,
        out_shape=jax.ShapeDtypeStruct((slab_rows, _G * e), x.dtype),
        grid_spec=pltpu.PrefetchScalarGridSpec(
            num_scalar_prefetch=0,
            grid=grid,
            in_specs=[
                # Row tiles stream through VMEM (double-buffered by Pallas).
                pl.BlockSpec((tile_slab, _G * c_in), lambda i: (i, 0)),
                # Constant block index -> weight DMA'd once, stays resident.
                pl.BlockSpec((_G * c_in, _G * e), lambda i: (0, 0)),
                pl.BlockSpec((1, _G * e), lambda i: (0, 0)),
            ],
            out_specs=pl.BlockSpec((tile_slab, _G * e), lambda i: (i, 0)),
        ),
        compiler_params=pltpu.CompilerParams(
            dimension_semantics=("parallel",),  # megacore-shardable on v7x
        ),
        cost_estimate=cost,
    )(x_slab, w_big, b_slab)

    # (m_pad/G, G*E) -> (m_pad, E) is a pure row-major metadata reshape.
    out2d = out_slab.reshape(m_pad, e)[:m]
    return out2d.reshape(*orig_shape[:-1], e)


if __name__ == "__main__":
    in_chans, embed_dim = 7, 48
    B, H, W = 2, 16, 16

    key = jax.random.PRNGKey(0)
    kx, kw, kb, kx2, kx3 = jax.random.split(key, 5)

    # Deterministic synthetic parameters (nn.Linear(in_chans, embed_dim) shapes).
    weight = jax.random.normal(kw, (embed_dim, in_chans), dtype=jnp.float32) * 0.1
    bias = jax.random.normal(kb, (embed_dim,), dtype=jnp.float32) * 0.1

    # Main case: channels-last image batch, M = B*H*W = 512 rows (aligned,
    # zero-copy into the kernel).
    x = jax.random.normal(kx, (B, H, W, in_chans), dtype=jnp.float32)
    out = jax.block_until_ready(patch_embed(x, weight, bias))
    ref = jnp.einsum("...c,ec->...e", x, weight) + bias
    assert out.shape == (B, H, W, embed_dim)
    assert jnp.allclose(out, ref, atol=1e-5, rtol=1e-5)

    # Ragged case: M = 3*5*7 = 105 exercises row padding to slab granularity.
    x2 = jax.random.normal(kx2, (3, 5, 7, in_chans), dtype=jnp.float32)
    out2 = jax.block_until_ready(patch_embed(x2, weight, bias))
    ref2 = jnp.einsum("...c,ec->...e", x2, weight) + bias
    assert out2.shape == (3, 5, 7, embed_dim)
    assert jnp.allclose(out2, ref2, atol=1e-5, rtol=1e-5)

    # Multi-tile case with a partial final block: M = 1*20*16 = 320 rows with
    # tile_rows=128 -> grid of 3 steps, last step masked.
    x3 = jax.random.normal(kx3, (1, 20, 16, in_chans), dtype=jnp.float32)
    out3 = jax.block_until_ready(patch_embed(x3, weight, bias, tile_rows=128))
    ref3 = jnp.einsum("...c,ec->...e", x3, weight) + bias
    assert out3.shape == (1, 20, 16, embed_dim)
    assert jnp.allclose(out3, ref3, atol=1e-5, rtol=1e-5)

    print("KERNEL_OK")
</pallas_src>

<mosaic_0001>
module attributes {stable_mosaic.version = 11 : i64} {
  func.func @_patch_embed_kernel(%arg0: i32, %arg1: memref<64x56xf32, #tpu.memory_space<vmem>>, %arg2: memref<56x384xf32, #tpu.memory_space<vmem>>, %arg3: memref<1x384xf32, #tpu.memory_space<vmem>>, %arg4: memref<64x384xf32, #tpu.memory_space<vmem>>) attributes {dimension_semantics = [#tpu.dimension_semantics<parallel>], iteration_bounds = array<i64: 1>, scalar_prefetch = 0 : i64, scratch_operands = 0 : i64, tpu.core_type = #tpu.core_type<tc>, window_params = [{transform_indices = @transform_0, window_bounds = array<i64: 64, 56>}, {pipeline_mode = #tpu.pipeline_mode<synchronous>, transform_indices = @transform_1, window_bounds = array<i64: 56, 384>}, {pipeline_mode = #tpu.pipeline_mode<synchronous>, transform_indices = @transform_2, window_bounds = array<i64: 1, 384>}, {transform_indices = @transform_3, window_bounds = array<i64: 64, 384>}]} {
    %c0 = arith.constant 0 : index
    %c0_0 = arith.constant 0 : index
    %0 = vector.load %arg1[%c0, %c0_0] : memref<64x56xf32, #tpu.memory_space<vmem>>, vector<64x56xf32>
    %c0_1 = arith.constant 0 : index
    %c0_2 = arith.constant 0 : index
    %1 = vector.load %arg2[%c0_1, %c0_2] : memref<56x384xf32, #tpu.memory_space<vmem>>, vector<56x384xf32>
    %cst = arith.constant dense<0.000000e+00> : vector<64x384xf32>
    %2 = tpu.matmul %0, %1, %cst {dimension_numbers = #tpu.dot_dimension_numbers<[1], [0], [0], [1], [0, 0, 1, 1], [], []>} : vector<64x56xf32>, vector<56x384xf32>, vector<64x384xf32> -> vector<64x384xf32>
    %c0_3 = arith.constant 0 : index
    %c0_4 = arith.constant 0 : index
    %3 = vector.load %arg3[%c0_3, %c0_4] : memref<1x384xf32, #tpu.memory_space<vmem>>, vector<1x384xf32>
    %4 = vector.broadcast %3 : vector<1x384xf32> to vector<64x384xf32>
    %5 = arith.addf %2, %4 : vector<64x384xf32>
    %c0_5 = arith.constant 0 : index
    %c0_6 = arith.constant 0 : index
    %6 = vector.load %arg4[%c0_5, %c0_6] : memref<64x384xf32, #tpu.memory_space<vmem>>, vector<64x384xf32>
    tpu.vector_store %arg4[%c0_5, %c0_6], %5 {strides = array<i32>} : memref<64x384xf32, #tpu.memory_space<vmem>>, vector<64x384xf32>,
    return
  }
  func.func @transform_0(%arg0: i32) -> (i32, i32) {
    %c0_i32 = arith.constant 0 : i32
    %c0_i32_0 = arith.constant 0 : i32
    return %arg0, %c0_i32 : i32, i32
  }
  func.func @transform_1(%arg0: i32) -> (i32, i32) {
    %c0_i32 = arith.constant 0 : i32
    %c0_i32_0 = arith.constant 0 : i32
    %c0_i32_1 = arith.constant 0 : i32
    return %c0_i32, %c0_i32_0 : i32, i32
  }
  func.func @transform_2(%arg0: i32) -> (i32, i32) {
    %c0_i32 = arith.constant 0 : i32
    %c0_i32_0 = arith.constant 0 : i32
    %c0_i32_1 = arith.constant 0 : i32
    return %c0_i32, %c0_i32_0 : i32, i32
  }
  func.func @transform_3(%arg0: i32) -> (i32, i32) {
    %c0_i32 = arith.constant 0 : i32
    %c0_i32_0 = arith.constant 0 : i32
    return %arg0, %c0_i32 : i32, i32
  }
}

</mosaic_0001>

<bundles_post_ra>
// kernel: tpu_custom_call.1
= control target key start
LH: loop header
LB: loop body
LE: loop exit
PB: predicated region body
PF: predicated region fallthrough
CT: control target
= control target key end

     0   :  { %8 = vsyncpa [#allocation3], 0  ;;  %s573_s0 = inlined_call_operand.vmem [shape: f32[64,56], index: 0, kind: input, shape index: {}]   ;;  %s574_s1 = inlined_call_operand.hbm [shape: f32[56,384], index: 1, kind: input, shape index: {}]   ;;  %s575_s2 = inlined_call_operand.vmem [shape: f32[1,384], index: 2, kind: input, shape index: {}]   ;;  %s576_s3 = inlined_call_operand.hbm [shape: f32[64,384], index: 3, kind: output, shape index: {}]  }
   0x1   :  { %9 = vsyncpa [#allocation4], 0  ;;  %s465_s12 = smov [#allocation2]  }
   0x2   :  { %s17_s13 = sshll.u32 %s465_s12, 4  ;;  %s18_s13 = int_to_ptr.vmem [resolvable:$true] %s17_s13 }
   0x3   :  { %s429_s14 = scalar_lea.vmem %s18_s13, 2688  ;;  %p434_p1 = scmp.lt.s32.totalorder %s18_s13, %s18_s13 }
   0x4   :  { %p430_p0 = scmp.ne.s32.totalorder %s18_s13, %s429_s14  ;;  %p435_p2 = scmp.lt.s32.totalorder %s429_s14, %s429_s14 }
   0x6   :  { %p436_p3 = por %p435_p2, %p434_p1 }
   0x8   :  { %p437_p4 = pnand %p436_p3, %p430_p0 }
   0xa   :  { %440 = shalt.err (!%p437_p4)
}
   0xb   :  { %s466_s15 = smov 384   ;;  %s467_s16 = smov 24  }
   0xc   :  { %23 = dma.hbm_to_vmem [thread:$0]  %s574_s1, 2688, %s18_s13, [#allocation3], %s466_s15, %s466_s15, %s467_s16  }
   0xd   :  { %461 = dma.done.wait [#allocation3], 2688  }
   0xe   :  { %462 = vsyncadd [#allocation3], 4294964608  ;;  %v468_v0 = vmov 0.0   ;;  %v56_v1 = vld [vmem:[#allocation2 + $0x98] sm:$0xff]  ;;  %v55_v2 = vld [vmem:[#allocation2 + $0x90] sm:$0xff]  ;;  %vm75_vm0 = vcmask 457728   ;;  %v60_v30 = vlaneseq }
   0xf   :  { %164 = vmatprep.mubr.f32.mxu0 %v468_v0  ;;  %v53_v3 = vld [vmem:[#allocation2 + $0x80] sm:$0xff]  ;;  %118 = vmatprep.subr.mxu0 %v56_v1  ;;  %v52_v4 = vld [vmem:[#allocation2 + $0x78] sm:$0xff]  ;;  %v50_v5 = vld [vmem:[#allocation2 + $0x68] sm:$0xff] }
  0x10   :  { %119 = vmatpush1.msra.mxu0 %v55_v2  ;;  %v49_v6 = vld [vmem:[#allocation2 + $0x60] sm:$0xff]  ;;  %v47_v7 = vld [vmem:[#allocation2 + $0x50] sm:$0xff]  ;;  %v46_v9 = vld [vmem:[#allocation2 + $0x48] sm:$0xff]  ;;  %v61_v31 = vshrl.u32 %v60_v30, 7 }
  0x11   :  { %120 = vmatprep.subr.mxu0 %v53_v3  ;;  %v29_v8 = vld [vmem:[%s573_s0] sm:$0xff]  ;;  %v54_v11 = vld [vmem:[#allocation2 + $0x88] sm:$0xff]  ;;  %v44_v12 = vld [vmem:[#allocation2 + $0x38] sm:$0xff] }
  0x12   :  { %121 = vmatpush1.msra.mxu0 %v52_v4  ;;  %v57_v10 = vld [vmem:[#allocation2 + $0xa0] sm:$0xff]  ;;  %404 = vmatprep.mubr.msk.f32.mxu1 %vm75_vm0, %v29_v8  ;;  %v43_v13 = vld [vmem:[#allocation2 + $0x30] sm:$0xff]  ;;  %v40_v16 = vld [vmem:[#allocation2 + $0x18] sm:$0xff]  ;;  %v62_v32 = vsub.s32 0, %v61_v31  ;;  %v66_v34 = vsub.s32 1, %v61_v31  ;;  %v70_v36 = vsub.s32 2, %v61_v31 }
  0x13   :  { %122 = vmatprep.subr.mxu0 %v50_v5  ;;  %390 = vmatprep.subr.mxu1 %v57_v10  ;;  %v51_v14 = vld [vmem:[#allocation2 + $0x70] sm:$0xff]  ;;  %v41_v15 = vld [vmem:[#allocation2 + $0x20] sm:$0xff]  ;;  %v48_v17 = vld [vmem:[#allocation2 + $0x58] sm:$0xff] }
  0x14   :  { %123 = vmatpush1.msra.mxu0 %v49_v6  ;;  %391 = vmatpush3.msra.mxu1 %v57_v10  ;;  %v38_v18 = vld [vmem:[#allocation2 + $0x8] sm:$0xff]  ;;  %v37_v19 = vld [vmem:[#allocation2] sm:$0xff]  ;;  %v39_v22 = vld [vmem:[#allocation2 + $0x10] sm:$0xff] }
  0x15   :  { %124 = vmatprep.subr.mxu0 %v47_v7  ;;  %392 = vmatprep.subr.mxu1 %v54_v11  ;;  %v45_v20 = vld [vmem:[#allocation2 + $0x40] sm:$0xff]  ;;  %v42_v21 = vld [vmem:[#allocation2 + $0x28] sm:$0xff]  ;;  %v31_v24 = vld [vmem:[%s573_s0 + $0x10] sm:$0xff] }
  0x16   :  { %125 = vmatpush1.msra.mxu0 %v46_v9  ;;  %393 = vmatpush3.msra.mxu1 %v54_v11  ;;  %v30_v23 = vld [vmem:[%s573_s0 + $0x8] sm:$0xff]  ;;  %v32_v25 = vld [vmem:[%s573_s0 + $0x18] sm:$0xff]  ;;  %v33_v26 = vld [vmem:[%s573_s0 + $0x20] sm:$0xff] }
  0x17   :  { %126 = vmatprep.subr.mxu0 %v44_v12  ;;  %394 = vmatprep.subr.mxu1 %v51_v14  ;;  %v35_v27 = vld [vmem:[%s573_s0 + $0x30] sm:$0xff]  ;;  %v34_v28 = vld [vmem:[%s573_s0 + $0x28] sm:$0xff]  ;;  %v36_v29 = vld [vmem:[%s573_s0 + $0x38] sm:$0xff] }
  0x18   :  { %127 = vmatpush1.msra.mxu0 %v43_v13  ;;  %395 = vmatpush3.msra.mxu1 %v51_v14  ;;  %v58_v33 = vld [vmem:[%s575_s2] sm:$0x7]  ;;  %s469_s2 = smov [#allocation5]  }
  0x19   :  { %128 = vmatprep.subr.mxu0 %v41_v15  ;;  %396 = vmatprep.subr.mxu1 %v48_v17  ;;  %v547_v35 = vrot.slane %v58_v33, %v62_v32  ;;  %v549_v37 = vrot.slane %v58_v33, %v66_v34  ;;  %v71_v41 = vrot.slane %v58_v33, %v70_v36  ;;  %s347_s8 = sshll.u32 %s469_s2, 4  ;;  %s348_s8 = int_to_ptr.vmem [resolvable:$true] %s347_s8 }
  0x1a   :  { %129 = vmatpush1.msra.mxu0 %v40_v16  ;;  %397 = vmatpush3.msra.mxu1 %v48_v17  ;;  %s441_s9 = scalar_lea.vmem %s348_s8, 3072  ;;  %p446_p6 = scmp.lt.s32.totalorder %s348_s8, %s348_s8 }
  0x1b   :  { %130 = vmatprep.subr.mxu0 %v38_v18  ;;  %398 = vmatprep.subr.mxu1 %v45_v20  ;;  %p442_p5 = scmp.ne.s32.totalorder %s348_s8, %s441_s9  ;;  %p447_p7 = scmp.lt.s32.totalorder %s441_s9, %s441_s9 }
  0x1c   :  { %131 = vmatpush1.msra.mxu0 %v37_v19  ;;  %399 = vmatpush3.msra.mxu1 %v45_v20 }
  0x1d   :  { %359 = vmatmul.mubr.msk.f32.vlgmr.msra.gmra.mxu0 %vm75_vm0, %v29_v8  ;;  %400 = vmatprep.subr.mxu1 %v42_v21  ;;  %p448_p8 = por %p447_p7, %p446_p6 }
  0x1e   :  { %170 = vmatprep.mubr.f32.mxu0 %v468_v0  ;;  %401 = vmatpush3.msra.mxu1 %v42_v21 }
  0x1f   :  { %402 = vmatprep.subr.mxu1 %v39_v22  ;;  %p449_p9 = pnand %p448_p8, %p442_p5 }
  0x20   :  { %403 = vmatpush3.msra.mxu1 %v39_v22 }
  0x21   :  { %360 = vmatmul.mubr.msk.f32.gmra.mxu0 %vm75_vm0, %v30_v23  ;;  %405 = vmatmul.mubr.msk.f32.vlgmr.msra.gmra.mxu1 %vm75_vm0, %v30_v23 }
  0x22   :  { %176 = vmatprep.mubr.f32.mxu0 %v468_v0  ;;  %407 = vmatprep.mubr.msk.f32.mxu1 %vm75_vm0, %v31_v24 }
  0x25   :  { %361 = vmatmul.mubr.msk.f32.gmra.mxu0 %vm75_vm0, %v31_v24  ;;  %408 = vmatmul.mubr.msk.f32.gmra.mxu1 %vm75_vm0, %v32_v25 }
  0x26   :  { %182 = vmatprep.mubr.f32.mxu0 %v468_v0  ;;  %410 = vmatprep.mubr.msk.f32.mxu1 %vm75_vm0, %v33_v26 }
  0x29   :  { %362 = vmatmul.mubr.msk.f32.gmra.mxu0 %vm75_vm0, %v32_v25  ;;  %411 = vmatmul.mubr.msk.f32.gmra.mxu1 %vm75_vm0, %v34_v28 }
  0x2a   :  { %188 = vmatprep.mubr.f32.mxu0 %v468_v0  ;;  %413 = vmatprep.mubr.msk.f32.mxu1 %vm75_vm0, %v35_v27 }
  0x2d   :  { %363 = vmatmul.mubr.msk.f32.gmra.mxu0 %vm75_vm0, %v33_v26  ;;  %414 = vmatmul.mubr.msk.f32.gmra.mxu1 %vm75_vm0, %v36_v29 }
  0x2e   :  { %194 = vmatprep.mubr.f32.mxu0 %v468_v0 }
  0x31   :  { %364 = vmatmul.mubr.msk.f32.gmra.mxu0 %vm75_vm0, %v34_v28 }
  0x32   :  { %200 = vmatprep.mubr.f32.mxu0 %v468_v0 }
  0x35   :  { %365 = vmatmul.mubr.msk.f32.gmra.mxu0 %vm75_vm0, %v35_v27 }
  0x36   :  { %206 = vmatprep.mubr.f32.mxu0 %v468_v0 }
  0x39   :  { %366 = vmatmul.mubr.msk.f32.gmra.mxu0 %vm75_vm0, %v36_v29 }
  0xdd   :  { %v166_v38 = vpop.f32.mrf.mxu0 }
  0xde   :  { %v167_v39 = vadd.f32 %v166_v38, %v547_v35 }
  0xdf   :  { %v168_v40 = vpop.f32.mrf.mxu0 }
  0xe0   :  { %318 = vst [vmem:[#allocation5] sm:$0xff] %v167_v39  ;;  %v169_v42 = vadd.f32 %v168_v40, %v549_v37 }
  0xe1   :  { %v172_v43 = vpop.f32.mrf.mxu0  ;;  %v406_v45 = vpop.f32.mrf.mxu1 }
  0xe2   :  { %319 = vst [vmem:[#allocation5 + $0x8] sm:$0xff] %v169_v42  ;;  %v173_v44 = vadd.f32 %v172_v43, %v547_v35  ;;  %v285_v47 = vadd.f32 %v406_v45, %v71_v41 }
  0xe3   :  { %v174_v46 = vpop.f32.mrf.mxu0  ;;  %v279_v49 = vpop.f32.mrf.mxu1 }
  0xe4   :  { %321 = vst [vmem:[#allocation5 + $0x18] sm:$0xff] %v173_v44  ;;  %v175_v48 = vadd.f32 %v174_v46, %v549_v37  ;;  %323 = vst [vmem:[#allocation5 + $0x28] sm:$0xff] %v285_v47  ;;  %v280_v51 = vadd.f32 %v279_v49, %v71_v41 }
  0xe5   :  { %v178_v50 = vpop.f32.mrf.mxu0  ;;  %v409_v53 = vpop.f32.mrf.mxu1 }
  0xe6   :  { %322 = vst [vmem:[#allocation5 + $0x20] sm:$0xff] %v175_v48  ;;  %v179_v52 = vadd.f32 %v178_v50, %v547_v35  ;;  %320 = vst [vmem:[#allocation5 + $0x10] sm:$0xff] %v280_v51  ;;  %v295_v55 = vadd.f32 %v409_v53, %v71_v41 }
  0xe7   :  { %v180_v54 = vpop.f32.mrf.mxu0  ;;  %v289_v57 = vpop.f32.mrf.mxu1 }
  0xe8   :  { %324 = vst [vmem:[#allocation5 + $0x30] sm:$0xff] %v179_v52  ;;  %v181_v56 = vadd.f32 %v180_v54, %v549_v37  ;;  %329 = vst [vmem:[#allocation5 + $0x58] sm:$0xff] %v295_v55  ;;  %v290_v59 = vadd.f32 %v289_v57, %v71_v41 }
  0xe9   :  { %v184_v58 = vpop.f32.mrf.mxu0  ;;  %v412_v61 = vpop.f32.mrf.mxu1 }
  0xea   :  { %325 = vst [vmem:[#allocation5 + $0x38] sm:$0xff] %v181_v56  ;;  %v185_v60 = vadd.f32 %v184_v58, %v547_v35  ;;  %326 = vst [vmem:[#allocation5 + $0x40] sm:$0xff] %v290_v59  ;;  %v305_v63 = vadd.f32 %v412_v61, %v71_v41 }
  0xeb   :  { %v186_v62 = vpop.f32.mrf.mxu0  ;;  %v299_v1 = vpop.f32.mrf.mxu1 }
  0xec   :  { %327 = vst [vmem:[#allocation5 + $0x48] sm:$0xff] %v185_v60  ;;  %v187_v0 = vadd.f32 %v186_v62, %v549_v37  ;;  %335 = vst [vmem:[#allocation5 + $0x88] sm:$0xff] %v305_v63  ;;  %v300_v3 = vadd.f32 %v299_v1, %v71_v41 }
  0xed   :  { %v190_v2 = vpop.f32.mrf.mxu0  ;;  %v415_v5 = vpop.f32.mrf.mxu1 }
  0xee   :  { %328 = vst [vmem:[#allocation5 + $0x50] sm:$0xff] %v187_v0  ;;  %v191_v4 = vadd.f32 %v190_v2, %v547_v35  ;;  %332 = vst [vmem:[#allocation5 + $0x70] sm:$0xff] %v300_v3  ;;  %v315_v7 = vadd.f32 %v415_v5, %v71_v41 }
  0xef   :  { %v192_v6 = vpop.f32.mrf.mxu0  ;;  %v309_v9 = vpop.f32.mrf.mxu1 }
  0xf0   :  { %330 = vst [vmem:[#allocation5 + $0x60] sm:$0xff] %v191_v4  ;;  %v193_v8 = vadd.f32 %v192_v6, %v549_v37  ;;  %341 = vst [vmem:[#allocation5 + $0xb8] sm:$0xff] %v315_v7  ;;  %v310_v11 = vadd.f32 %v309_v9, %v71_v41 }
  0xf1   :  { %v196_v10 = vpop.f32.mrf.mxu0 }
  0xf2   :  { %331 = vst [vmem:[#allocation5 + $0x68] sm:$0xff] %v193_v8  ;;  %v197_v12 = vadd.f32 %v196_v10, %v547_v35  ;;  %338 = vst [vmem:[#allocation5 + $0xa0] sm:$0xff] %v310_v11 }
  0xf3   :  { %v198_v13 = vpop.f32.mrf.mxu0 }
  0xf4   :  { %333 = vst [vmem:[#allocation5 + $0x78] sm:$0xff] %v197_v12  ;;  %v199_v14 = vadd.f32 %v198_v13, %v549_v37 }
  0xf5   :  { %v202_v15 = vpop.f32.mrf.mxu0 }
  0xf6   :  { %334 = vst [vmem:[#allocation5 + $0x80] sm:$0xff] %v199_v14  ;;  %v203_v16 = vadd.f32 %v202_v15, %v547_v35 }
  0xf7   :  { %v204_v17 = vpop.f32.mrf.mxu0 }
  0xf8   :  { %336 = vst [vmem:[#allocation5 + $0x90] sm:$0xff] %v203_v16  ;;  %v205_v18 = vadd.f32 %v204_v17, %v549_v37 }
  0xf9   :  { %v208_v19 = vpop.f32.mrf.mxu0 }
  0xfa   :  { %337 = vst [vmem:[#allocation5 + $0x98] sm:$0xff] %v205_v18  ;;  %v209_v20 = vadd.f32 %v208_v19, %v547_v35 }
  0xfb   :  { %v210_v21 = vpop.f32.mrf.mxu0 }
  0xfc   :  { %339 = vst [vmem:[#allocation5 + $0xa8] sm:$0xff] %v209_v20  ;;  %v211_v22 = vadd.f32 %v210_v21, %v549_v37 }
  0xfe   :  { %340 = vst [vmem:[#allocation5 + $0xb0] sm:$0xff] %v211_v22 }
  0xff   :  { %452 = shalt.err (!%p449_p9)
}
 0x100   :  { %353 = dma.vmem_to_hbm [thread:$0]  %s348_s8, 3072, %s576_s3, [#allocation4], %s466_s15, %s466_s15, %s467_s16  }
 0x101   :  { %463 = dma.done.wait [#allocation4], 3072  }
 0x102   :  { %464 = vsyncadd [#allocation4], 4294964224 }
 0x103   :  { %357 = vsyncpa [#allocation3], 1 }
 0x104   :  { %358 = vsyncpa [#allocation4], 1 }

</bundles_post_ra>
